<compile_context>
chip_gen: v6e
topology: v6e:2x2x1
jax: 0.10.0
libtpu: 0.0.40
codegen_flags: <defaults>
</compile_context>

<pallas_src>
import math
import functools

import jax
import jax.numpy as jnp
from jax import lax
from jax.experimental import pallas as pl
from jax.experimental.pallas import tpu as pltpu


# --------------------------------- helpers ---------------------------------
def _layer_norm(h, gamma, beta, eps=1e-5):
    mu = jnp.mean(h, axis=-1, keepdims=True)
    var = jnp.mean((h - mu) ** 2, axis=-1, keepdims=True)
    return (h - mu) * lax.rsqrt(var + eps) * gamma + beta


def _gelu_tanh(x):
    c = math.sqrt(2.0 / math.pi)
    return 0.5 * x * (1.0 + jnp.tanh(c * (x + 0.044715 * x * x * x)))


def _vmem_cap_bytes():
    try:
        return int(pltpu.get_tpu_info().vmem_capacity_bytes)
    except Exception:
        return 64 * 1024 * 1024  # conservative (v7x per-core figure)


def _pick_t_block(t):
    # larger sequence tiles on 128 MiB VMEM chips (v5e/v6e); cap at 256 on v7x
    cands = [256, 128, 64, 32, 16, 8]
    if _vmem_cap_bytes() >= 96 * 1024 * 1024:
        cands = [512] + cands
    for blk in cands:
        if t % blk == 0:
            return blk
    return t  # full-extent block (allowed: equals the array dim)


def _pick_ff_block(ffdim):
    for blk in (2048, 1600, 1536, 1280, 1024, 512, 384, 256, 128):
        if ffdim % blk == 0:
            return blk
    return ffdim


def _compiler_params(dim_sem):
    kwargs = dict(dimension_semantics=dim_sem)
    try:
        cap = pltpu.get_tpu_info().vmem_capacity_bytes
        kwargs["vmem_limit_bytes"] = int(min(100 * 1024 * 1024, (cap * 3) // 4))
    except Exception:
        pass  # fall back to the default scoped VMEM limit
    return pltpu.CompilerParams(**kwargs)


# ------------------------- kernel 1: ln_1 + QKV proj -------------------------
def qkv_kernel(n_head, x_ref, ln1_g_ref, ln1_b_ref, w_attn_ref, b_attn_ref,
               q_ref, k_ref, v_ref):
    x = x_ref[...]                                      # (blk_t, C) f32
    C = x.shape[-1]
    hd = C // n_head
    scale = 1.0 / math.sqrt(hd)

    h = _layer_norm(x, ln1_g_ref[...], ln1_b_ref[...])  # f32
    qkv = jnp.dot(h.astype(jnp.bfloat16), w_attn_ref[...],
                  preferred_element_type=jnp.float32) + b_attn_ref[...]  # (blk_t, 3C) f32

    # Emit q/k/v head-major directly (static lane slices -> per-head slabs).
    for hh in range(n_head):
        lo = hh * hd
        q_ref[hh] = (qkv[:, lo:lo + hd] * scale).astype(q_ref.dtype)       # scale folded into q
        k_ref[hh] = qkv[:, C + lo:C + lo + hd].astype(k_ref.dtype)
        v_ref[hh] = qkv[:, 2 * C + lo:2 * C + lo + hd].astype(v_ref.dtype)


# ----------- kernel 2: causal flash attention + out-proj + residual-1 -----------
def attn_kernel(x_ref, q_ref, k_ref, v_ref, w_ap_ref, b_ap_ref,
                x1_ref, m_ref, l_ref, acc_y_ref, acc_out_ref):
    i = pl.program_id(1)        # query block
    h = pl.program_id(2)        # head
    kv = pl.program_id(3)       # kv block
    n_head = pl.num_programs(2)
    n_kv = pl.num_programs(3)

    blk_q = q_ref.shape[0]
    blk_kv = k_ref.shape[0]

    @pl.when((h == 0) & (kv == 0))
    def _init_out():
        acc_out_ref[...] = jnp.zeros_like(acc_out_ref)

    @pl.when(kv == 0)
    def _init_head():
        m_ref[...] = jnp.full_like(m_ref, -jnp.inf)
        l_ref[...] = jnp.zeros_like(l_ref)
        acc_y_ref[...] = jnp.zeros_like(acc_y_ref)

    # last KV block that overlaps the causal triangle for this query block
    last_needed = (i * blk_q + blk_q - 1) // blk_kv

    @pl.when(kv <= last_needed)
    def _online_softmax_step():
        q = q_ref[...]                                  # (blk_q, hd) bf16, pre-scaled
        k = k_ref[...]                                  # (blk_kv, hd) bf16
        v = v_ref[...]                                  # (blk_kv, hd) bf16

        s = lax.dot_general(q, k, (((1,), (1,)), ((), ())),
                            preferred_element_type=jnp.float32)   # (blk_q, blk_kv) f32
        row = i * blk_q + lax.broadcasted_iota(jnp.int32, s.shape, 0)
        col = kv * blk_kv + lax.broadcasted_iota(jnp.int32, s.shape, 1)
        s = jnp.where(row >= col, s, -1e30)             # finite sentinel, no NaNs

        m_prev = m_ref[...]
        m_new = jnp.maximum(m_prev, jnp.max(s, axis=-1, keepdims=True))
        alpha = jnp.exp(m_prev - m_new)
        p = jnp.exp(s - m_new)
        l_ref[...] = alpha * l_ref[...] + jnp.sum(p, axis=-1, keepdims=True)
        acc_y_ref[...] = alpha * acc_y_ref[...] + jnp.dot(
            p.astype(jnp.bfloat16), v, preferred_element_type=jnp.float32)
        m_ref[...] = m_new

    @pl.when(kv == n_kv - 1)
    def _head_finalize():
        inv = pl.reciprocal(l_ref[...], approx=True)    # EUP reciprocal
        y = (acc_y_ref[...] * inv).astype(jnp.bfloat16) # (blk_q, hd)
        # accumulate this head's share of the output projection (full-width C)
        acc_out_ref[...] += jnp.dot(y, w_ap_ref[...],
                                    preferred_element_type=jnp.float32)

    @pl.when((h == n_head - 1) & (kv == n_kv - 1))
    def _finalize():
        x1_ref[...] = (x_ref[...] + acc_out_ref[...]
                       + b_ap_ref[...]).astype(x1_ref.dtype)     # residual 1


# ------------------ kernel 3: ln_2 + MLP (tiled 4C) + residual-2 ------------------
def mlp_kernel(x1_ref, ln2_g_ref, ln2_b_ref, w_fc_ref, b_fc_ref,
               w_mp_ref, b_mp_ref, out_ref, h2_ref, acc_ref):
    ff = pl.program_id(2)
    n_ff = pl.num_programs(2)

    @pl.when(ff == 0)
    def _init():
        h2 = _layer_norm(x1_ref[...], ln2_g_ref[...], ln2_b_ref[...])
        h2_ref[...] = h2.astype(h2_ref.dtype)           # bf16 MXU feed, computed once
        acc_ref[...] = jnp.zeros_like(acc_ref)

    fc = jnp.dot(h2_ref[...], w_fc_ref[...],
                 preferred_element_type=jnp.float32) + b_fc_ref[...]   # (blk_t, blk_ff) f32
    g = _gelu_tanh(fc)
    acc_ref[...] += jnp.dot(g.astype(jnp.bfloat16), w_mp_ref[...],
                            preferred_element_type=jnp.float32)

    @pl.when(ff == n_ff - 1)
    def _finalize():
        out_ref[...] = (x1_ref[...] + acc_ref[...]
                        + b_mp_ref[...]).astype(out_ref.dtype)   # residual 2


# --------------------------------- wrapper ---------------------------------
def gpt2_block(x, params, n_head):
    B, T, C = x.shape
    assert C % n_head == 0
    hd = C // n_head
    assert hd % 8 == 0, "head dim must be a multiple of 8 for TPU tiling"

    blk_t = _pick_t_block(T)
    nt = T // blk_t
    n_kv = T // blk_t
    bf16 = jnp.bfloat16

    # weights cast once to bf16 for the MXU (biases / LN params stay f32)
    w_attn = params["w_attn"].astype(bf16)
    w_aproj = params["w_aproj"].astype(bf16)
    w_fc = params["w_fc"].astype(bf16)
    w_mproj = params["w_mproj"].astype(bf16)

    # ---- kernel 1: ln_1 + QKV projection, head-major q/k/v ----
    qkv_out_spec = pl.BlockSpec((None, n_head, blk_t, hd), lambda b, i: (b, 0, i, 0))

    q, k, v = pl.pallas_call(
        functools.partial(qkv_kernel, n_head),
        out_shape=tuple(jax.ShapeDtypeStruct((B, n_head, T, hd), bf16) for _ in range(3)),
        grid_spec=pltpu.PrefetchScalarGridSpec(
            num_scalar_prefetch=0,
            grid=(B, nt),
            in_specs=[
                pl.BlockSpec((None, blk_t, C), lambda b, i: (b, i, 0)),   # x
                pl.BlockSpec((1, C), lambda b, i: (0, 0)),                # ln1 gamma
                pl.BlockSpec((1, C), lambda b, i: (0, 0)),                # ln1 beta
                pl.BlockSpec((C, 3 * C), lambda b, i: (0, 0)),            # W_attn
                pl.BlockSpec((1, 3 * C), lambda b, i: (0, 0)),            # b_attn
            ],
            out_specs=[qkv_out_spec, qkv_out_spec, qkv_out_spec]),
        compiler_params=_compiler_params(("parallel", "parallel")),
    )(x, params["ln1_g"], params["ln1_b"], w_attn, params["b_attn"])

    # ---- kernel 2: causal flash attention + output projection + residual-1 ----
    def kv_map(b, i, h, kvb):
        # KV blocks entirely above the causal diagonal are clamped to the last
        # needed block: the pipeline sees an unchanged block index and skips the
        # DMA; compute for them is gated off in-kernel.
        last_needed = (i * blk_t + blk_t - 1) // blk_t
        return (b, h, jnp.minimum(kvb, last_needed), 0)

    x1 = pl.pallas_call(
        attn_kernel,
        out_shape=jax.ShapeDtypeStruct((B, T, C), jnp.float32),
        grid_spec=pltpu.PrefetchScalarGridSpec(
            num_scalar_prefetch=0,
            grid=(B, nt, n_head, n_kv),
            in_specs=[
                pl.BlockSpec((None, blk_t, C), lambda b, i, h, kvb: (b, i, 0)),           # x (residual)
                pl.BlockSpec((None, None, blk_t, hd), lambda b, i, h, kvb: (b, h, i, 0)), # q block
                pl.BlockSpec((None, None, blk_t, hd), kv_map),                            # k block
                pl.BlockSpec((None, None, blk_t, hd), kv_map),                            # v block
                pl.BlockSpec((hd, C), lambda b, i, h, kvb: (h, 0)),                       # W_proj head slice
                pl.BlockSpec((1, C), lambda b, i, h, kvb: (0, 0)),                        # b_proj
            ],
            out_specs=pl.BlockSpec((None, blk_t, C), lambda b, i, h, kvb: (b, i, 0)),
            scratch_shapes=[
                pltpu.VMEM((blk_t, 1), jnp.float32),    # running max m
                pltpu.VMEM((blk_t, 1), jnp.float32),    # running denom l
                pltpu.VMEM((blk_t, hd), jnp.float32),   # per-head y accumulator
                pltpu.VMEM((blk_t, C), jnp.float32),    # output-projection accumulator
            ]),
        compiler_params=_compiler_params(
            ("parallel", "parallel", "arbitrary", "arbitrary")),
    )(x, q, k, v, w_aproj, params["b_aproj"])

    # ---- kernel 3: ln_2 + MLP (hidden dim tiled) + residual-2 ----
    ff_dim = 4 * C
    blk_ff = _pick_ff_block(ff_dim)
    n_ff = ff_dim // blk_ff

    out = pl.pallas_call(
        mlp_kernel,
        out_shape=jax.ShapeDtypeStruct((B, T, C), x.dtype),
        grid_spec=pltpu.PrefetchScalarGridSpec(
            num_scalar_prefetch=0,
            grid=(B, nt, n_ff),
            in_specs=[
                pl.BlockSpec((None, blk_t, C), lambda b, i, f: (b, i, 0)),   # x1
                pl.BlockSpec((1, C), lambda b, i, f: (0, 0)),                # ln2 gamma
                pl.BlockSpec((1, C), lambda b, i, f: (0, 0)),                # ln2 beta
                pl.BlockSpec((C, blk_ff), lambda b, i, f: (0, f)),           # W_fc column tile
                pl.BlockSpec((1, blk_ff), lambda b, i, f: (0, f)),           # b_fc tile
                pl.BlockSpec((blk_ff, C), lambda b, i, f: (f, 0)),           # W_mproj row tile
                pl.BlockSpec((1, C), lambda b, i, f: (0, 0)),                # b_mproj
            ],
            out_specs=pl.BlockSpec((None, blk_t, C), lambda b, i, f: (b, i, 0)),
            scratch_shapes=[
                pltpu.VMEM((blk_t, C), bf16),           # ln_2(x1) (computed once, MXU feed)
                pltpu.VMEM((blk_t, C), jnp.float32),    # MLP output accumulator
            ]),
        compiler_params=_compiler_params(("parallel", "parallel", "arbitrary")),
    )(x1, params["ln2_g"], params["ln2_b"], w_fc, params["b_fc"],
      w_mproj, params["b_mproj"])

    return out


# ----------------------- pure-JAX reference (sanity check) -----------------------
def reference_block(x, params, n_head):
    B, T, C = x.shape
    hd = C // n_head

    def ln(h, g, b):
        mu = jnp.mean(h, axis=-1, keepdims=True)
        var = jnp.mean((h - mu) ** 2, axis=-1, keepdims=True)
        return (h - mu) / jnp.sqrt(var + 1e-5) * g + b

    h1 = ln(x, params["ln1_g"], params["ln1_b"])
    qkv = h1 @ params["w_attn"] + params["b_attn"]
    q, k, v = jnp.split(qkv, 3, axis=-1)
    q = q.reshape(B, T, n_head, hd).transpose(0, 2, 1, 3)
    k = k.reshape(B, T, n_head, hd).transpose(0, 2, 1, 3)
    v = v.reshape(B, T, n_head, hd).transpose(0, 2, 1, 3)
    att = (q @ jnp.swapaxes(k, -2, -1)) / math.sqrt(hd)
    mask = jnp.tril(jnp.ones((T, T), dtype=bool))
    att = jnp.where(mask[None, None], att, -jnp.inf)
    att = jax.nn.softmax(att, axis=-1)
    y = (att @ v).transpose(0, 2, 1, 3).reshape(B, T, C)
    x1 = x + (y @ params["w_aproj"] + params["b_aproj"])

    h2 = ln(x1, params["ln2_g"], params["ln2_b"])
    fc = h2 @ params["w_fc"] + params["b_fc"]
    c = math.sqrt(2.0 / math.pi)
    g = 0.5 * fc * (1.0 + jnp.tanh(c * (fc + 0.044715 * fc ** 3)))
    return x1 + (g @ params["w_mproj"] + params["b_mproj"])


if __name__ == "__main__":
    # Small GPT-2-like config: n_embd=256, n_head=2 (head_dim=128), seq=8, batch=2.
    B, T, C, n_head = 2, 8, 256, 2

    key = jax.random.PRNGKey(0)
    ks = jax.random.split(key, 9)

    params = {
        "ln1_g": jnp.ones((1, C), jnp.float32),
        "ln1_b": jnp.zeros((1, C), jnp.float32),
        "w_attn": 0.02 * jax.random.normal(ks[0], (C, 3 * C), jnp.float32),
        "b_attn": 0.02 * jax.random.normal(ks[1], (1, 3 * C), jnp.float32),
        "w_aproj": 0.02 * jax.random.normal(ks[2], (C, C), jnp.float32),
        "b_aproj": 0.02 * jax.random.normal(ks[3], (1, C), jnp.float32),
        "ln2_g": jnp.ones((1, C), jnp.float32),
        "ln2_b": jnp.zeros((1, C), jnp.float32),
        "w_fc": 0.02 * jax.random.normal(ks[4], (C, 4 * C), jnp.float32),
        "b_fc": 0.02 * jax.random.normal(ks[5], (1, 4 * C), jnp.float32),
        "w_mproj": 0.02 * jax.random.normal(ks[6], (4 * C, C), jnp.float32),
        "b_mproj": 0.02 * jax.random.normal(ks[7], (1, C), jnp.float32),
    }

    x = jax.random.normal(ks[8], (B, T, C), jnp.float32)

    out = jax.block_until_ready(gpt2_block(x, params, n_head))
    ref = reference_block(x, params, n_head)

    assert out.shape == (B, T, C)
    max_err = float(jnp.max(jnp.abs(out - ref)))
    assert jnp.allclose(out, ref, atol=2e-2, rtol=2e-2), f"mismatch vs reference (max err {max_err})"

    print("KERNEL_OK")
</pallas_src>

<mosaic_0001>
module attributes {stable_mosaic.version = 11 : i64} {
  func.func @qkv_kernel(%arg0: i32, %arg1: i32, %arg2: memref<1x8x256xf32, #tpu.memory_space<vmem>>, %arg3: memref<1x256xf32, #tpu.memory_space<vmem>>, %arg4: memref<1x256xf32, #tpu.memory_space<vmem>>, %arg5: memref<256x768xbf16, #tpu.memory_space<vmem>>, %arg6: memref<1x768xf32, #tpu.memory_space<vmem>>, %arg7: memref<1x2x8x128xbf16, #tpu.memory_space<vmem>>, %arg8: memref<1x2x8x128xbf16, #tpu.memory_space<vmem>>, %arg9: memref<1x2x8x128xbf16, #tpu.memory_space<vmem>>) attributes {dimension_semantics = [#tpu.dimension_semantics<parallel>, #tpu.dimension_semantics<parallel>], iteration_bounds = array<i64: 2, 1>, scalar_prefetch = 0 : i64, scratch_operands = 0 : i64, tpu.core_type = #tpu.core_type<tc>, window_params = [{transform_indices = @transform_0, window_bounds = array<i64: 1, 8, 256>}, {pipeline_mode = #tpu.pipeline_mode<synchronous>, transform_indices = @transform_1, window_bounds = array<i64: 1, 256>}, {pipeline_mode = #tpu.pipeline_mode<synchronous>, transform_indices = @transform_2, window_bounds = array<i64: 1, 256>}, {pipeline_mode = #tpu.pipeline_mode<synchronous>, transform_indices = @transform_3, window_bounds = array<i64: 256, 768>}, {pipeline_mode = #tpu.pipeline_mode<synchronous>, transform_indices = @transform_4, window_bounds = array<i64: 1, 768>}, {transform_indices = @transform_5, window_bounds = array<i64: 1, 2, 8, 128>}, {transform_indices = @transform_6, window_bounds = array<i64: 1, 2, 8, 128>}, {transform_indices = @transform_7, window_bounds = array<i64: 1, 2, 8, 128>}]} {
    %c0 = arith.constant 0 : index
    %c0_0 = arith.constant 0 : index
    %c0_1 = arith.constant 0 : index
    %0 = vector.load %arg2[%c0, %c0_0, %c0_1] : memref<1x8x256xf32, #tpu.memory_space<vmem>>, vector<1x8x256xf32>
    %1 = vector.shape_cast %0 : vector<1x8x256xf32> to vector<8x256xf32>
    %c0_2 = arith.constant 0 : index
    %c0_3 = arith.constant 0 : index
    %2 = vector.load %arg3[%c0_2, %c0_3] : memref<1x256xf32, #tpu.memory_space<vmem>>, vector<1x256xf32>
    %c0_4 = arith.constant 0 : index
    %c0_5 = arith.constant 0 : index
    %3 = vector.load %arg4[%c0_4, %c0_5] : memref<1x256xf32, #tpu.memory_space<vmem>>, vector<1x256xf32>
    %cst = arith.constant dense<0.000000e+00> : vector<8xf32>
    %4 = vector.multi_reduction <add>, %1, %cst [1] : vector<8x256xf32> to vector<8xf32>
    %5 = vector.shape_cast %4 : vector<8xf32> to vector<8x1xf32>
    %cst_6 = arith.constant 2.560000e+02 : f32
    %6 = vector.broadcast %cst_6 : f32 to vector<8x1xf32>
    %7 = arith.divf %5, %6 : vector<8x1xf32>
    %8 = vector.broadcast %7 : vector<8x1xf32> to vector<8x256xf32>
    %9 = arith.subf %1, %8 : vector<8x256xf32>
    %10 = arith.mulf %9, %9 : vector<8x256xf32>
    %cst_7 = arith.constant dense<0.000000e+00> : vector<8xf32>
    %11 = vector.multi_reduction <add>, %10, %cst_7 [1] : vector<8x256xf32> to vector<8xf32>
    %12 = vector.shape_cast %11 : vector<8xf32> to vector<8x1xf32>
    %cst_8 = arith.constant 2.560000e+02 : f32
    %13 = vector.broadcast %cst_8 : f32 to vector<8x1xf32>
    %14 = arith.divf %12, %13 : vector<8x1xf32>
    %15 = vector.broadcast %7 : vector<8x1xf32> to vector<8x256xf32>
    %16 = arith.subf %1, %15 : vector<8x256xf32>
    %cst_9 = arith.constant 9.99999974E-6 : f32
    %17 = vector.broadcast %cst_9 : f32 to vector<8x1xf32>
    %18 = arith.addf %14, %17 : vector<8x1xf32>
    %19 = math.rsqrt %18 : vector<8x1xf32>
    %20 = vector.broadcast %19 : vector<8x1xf32> to vector<8x256xf32>
    %21 = arith.mulf %16, %20 : vector<8x256xf32>
    %22 = vector.broadcast %2 : vector<1x256xf32> to vector<8x256xf32>
    %23 = arith.mulf %21, %22 : vector<8x256xf32>
    %24 = vector.broadcast %3 : vector<1x256xf32> to vector<8x256xf32>
    %25 = arith.addf %23, %24 : vector<8x256xf32>
    %26 = arith.truncf %25 : vector<8x256xf32> to vector<8x256xbf16>
    %c0_10 = arith.constant 0 : index
    %c0_11 = arith.constant 0 : index
    %27 = vector.load %arg5[%c0_10, %c0_11] : memref<256x768xbf16, #tpu.memory_space<vmem>>, vector<256x768xbf16>
    %cst_12 = arith.constant dense<0.000000e+00> : vector<8x768xf32>
    %28 = tpu.matmul %26, %27, %cst_12 {dimension_numbers = #tpu.dot_dimension_numbers<[1], [0], [0], [1], [0, 0, 1, 1], [], []>} : vector<8x256xbf16>, vector<256x768xbf16>, vector<8x768xf32> -> vector<8x768xf32>
    %c0_13 = arith.constant 0 : index
    %c0_14 = arith.constant 0 : index
    %29 = vector.load %arg6[%c0_13, %c0_14] : memref<1x768xf32, #tpu.memory_space<vmem>>, vector<1x768xf32>
    %30 = vector.broadcast %29 : vector<1x768xf32> to vector<8x768xf32>
    %31 = arith.addf %28, %30 : vector<8x768xf32>
    %32 = vector.extract_strided_slice %31 {offsets = [0, 0], sizes = [8, 128], strides = [1, 1]} : vector<8x768xf32> to vector<8x128xf32>
    %cst_15 = arith.constant 0.0883883461 : f32
    %33 = vector.broadcast %cst_15 : f32 to vector<8x128xf32>
    %34 = arith.mulf %32, %33 : vector<8x128xf32>
    %35 = arith.truncf %34 : vector<8x128xf32> to vector<8x128xbf16>
    %c0_16 = arith.constant 0 : index
    %c0_17 = arith.constant 0 : index
    %c0_18 = arith.constant 0 : index
    %c0_19 = arith.constant 0 : index
    %36 = vector.load %arg7[%c0_16, %c0_17, %c0_18, %c0_19] : memref<1x2x8x128xbf16, #tpu.memory_space<vmem>>, vector<1x1x8x128xbf16>
    %37 = vector.shape_cast %36 : vector<1x1x8x128xbf16> to vector<8x128xbf16>
    %38 = vector.shape_cast %35 : vector<8x128xbf16> to vector<1x1x8x128xbf16>
    tpu.vector_store %arg7[%c0_16, %c0_17, %c0_18, %c0_19], %38 {strides = array<i32>} : memref<1x2x8x128xbf16, #tpu.memory_space<vmem>>, vector<1x1x8x128xbf16>,
    %39 = vector.extract_strided_slice %31 {offsets = [0, 256], sizes = [8, 128], strides = [1, 1]} : vector<8x768xf32> to vector<8x128xf32>
    %40 = arith.truncf %39 : vector<8x128xf32> to vector<8x128xbf16>
    %c0_20 = arith.constant 0 : index
    %c0_21 = arith.constant 0 : index
    %c0_22 = arith.constant 0 : index
    %c0_23 = arith.constant 0 : index
    %41 = vector.load %arg8[%c0_20, %c0_21, %c0_22, %c0_23] : memref<1x2x8x128xbf16, #tpu.memory_space<vmem>>, vector<1x1x8x128xbf16>
    %42 = vector.shape_cast %41 : vector<1x1x8x128xbf16> to vector<8x128xbf16>
    %43 = vector.shape_cast %40 : vector<8x128xbf16> to vector<1x1x8x128xbf16>
    tpu.vector_store %arg8[%c0_20, %c0_21, %c0_22, %c0_23], %43 {strides = array<i32>} : memref<1x2x8x128xbf16, #tpu.memory_space<vmem>>, vector<1x1x8x128xbf16>,
    %44 = vector.extract_strided_slice %31 {offsets = [0, 512], sizes = [8, 128], strides = [1, 1]} : vector<8x768xf32> to vector<8x128xf32>
    %45 = arith.truncf %44 : vector<8x128xf32> to vector<8x128xbf16>
    %c0_24 = arith.constant 0 : index
    %c0_25 = arith.constant 0 : index
    %c0_26 = arith.constant 0 : index
    %c0_27 = arith.constant 0 : index
    %46 = vector.load %arg9[%c0_24, %c0_25, %c0_26, %c0_27] : memref<1x2x8x128xbf16, #tpu.memory_space<vmem>>, vector<1x1x8x128xbf16>
    %47 = vector.shape_cast %46 : vector<1x1x8x128xbf16> to vector<8x128xbf16>
    %48 = vector.shape_cast %45 : vector<8x128xbf16> to vector<1x1x8x128xbf16>
    tpu.vector_store %arg9[%c0_24, %c0_25, %c0_26, %c0_27], %48 {strides = array<i32>} : memref<1x2x8x128xbf16, #tpu.memory_space<vmem>>, vector<1x1x8x128xbf16>,
    %49 = vector.extract_strided_slice %31 {offsets = [0, 128], sizes = [8, 128], strides = [1, 1]} : vector<8x768xf32> to vector<8x128xf32>
    %cst_28 = arith.constant 0.0883883461 : f32
    %50 = vector.broadcast %cst_28 : f32 to vector<8x128xf32>
    %51 = arith.mulf %49, %50 : vector<8x128xf32>
    %52 = arith.truncf %51 : vector<8x128xf32> to vector<8x128xbf16>
    %c0_29 = arith.constant 0 : index
    %c1 = arith.constant 1 : index
    %c0_30 = arith.constant 0 : index
    %c0_31 = arith.constant 0 : index
    %53 = vector.load %arg7[%c0_29, %c1, %c0_30, %c0_31] : memref<1x2x8x128xbf16, #tpu.memory_space<vmem>>, vector<1x1x8x128xbf16>
    %54 = vector.shape_cast %53 : vector<1x1x8x128xbf16> to vector<8x128xbf16>
    %55 = vector.shape_cast %52 : vector<8x128xbf16> to vector<1x1x8x128xbf16>
    tpu.vector_store %arg7[%c0_29, %c1, %c0_30, %c0_31], %55 {strides = array<i32>} : memref<1x2x8x128xbf16, #tpu.memory_space<vmem>>, vector<1x1x8x128xbf16>,
    %56 = vector.extract_strided_slice %31 {offsets = [0, 384], sizes = [8, 128], strides = [1, 1]} : vector<8x768xf32> to vector<8x128xf32>
    %57 = arith.truncf %56 : vector<8x128xf32> to vector<8x128xbf16>
    %c0_32 = arith.constant 0 : index
    %c1_33 = arith.constant 1 : index
    %c0_34 = arith.constant 0 : index
    %c0_35 = arith.constant 0 : index
    %58 = vector.load %arg8[%c0_32, %c1_33, %c0_34, %c0_35] : memref<1x2x8x128xbf16, #tpu.memory_space<vmem>>, vector<1x1x8x128xbf16>
    %59 = vector.shape_cast %58 : vector<1x1x8x128xbf16> to vector<8x128xbf16>
    %60 = vector.shape_cast %57 : vector<8x128xbf16> to vector<1x1x8x128xbf16>
    tpu.vector_store %arg8[%c0_32, %c1_33, %c0_34, %c0_35], %60 {strides = array<i32>} : memref<1x2x8x128xbf16, #tpu.memory_space<vmem>>, vector<1x1x8x128xbf16>,
    %61 = vector.extract_strided_slice %31 {offsets = [0, 640], sizes = [8, 128], strides = [1, 1]} : vector<8x768xf32> to vector<8x128xf32>
    %62 = arith.truncf %61 : vector<8x128xf32> to vector<8x128xbf16>
    %c0_36 = arith.constant 0 : index
    %c1_37 = arith.constant 1 : index
    %c0_38 = arith.constant 0 : index
    %c0_39 = arith.constant 0 : index
    %63 = vector.load %arg9[%c0_36, %c1_37, %c0_38, %c0_39] : memref<1x2x8x128xbf16, #tpu.memory_space<vmem>>, vector<1x1x8x128xbf16>
    %64 = vector.shape_cast %63 : vector<1x1x8x128xbf16> to vector<8x128xbf16>
    %65 = vector.shape_cast %62 : vector<8x128xbf16> to vector<1x1x8x128xbf16>
    tpu.vector_store %arg9[%c0_36, %c1_37, %c0_38, %c0_39], %65 {strides = array<i32>} : memref<1x2x8x128xbf16, #tpu.memory_space<vmem>>, vector<1x1x8x128xbf16>,
    return
  }
  func.func @transform_0(%arg0: i32, %arg1: i32) -> (i32, i32, i32) {
    %c0_i32 = arith.constant 0 : i32
    %c0_i32_0 = arith.constant 0 : i32
    return %arg0, %arg1, %c0_i32 : i32, i32, i32
  }
  func.func @transform_1(%arg0: i32, %arg1: i32) -> (i32, i32) {
    %c0_i32 = arith.constant 0 : i32
    %c0_i32_0 = arith.constant 0 : i32
    %c0_i32_1 = arith.constant 0 : i32
    return %c0_i32, %c0_i32_0 : i32, i32
  }
  func.func @transform_2(%arg0: i32, %arg1: i32) -> (i32, i32) {
    %c0_i32 = arith.constant 0 : i32
    %c0_i32_0 = arith.constant 0 : i32
    %c0_i32_1 = arith.constant 0 : i32
    return %c0_i32, %c0_i32_0 : i32, i32
  }
  func.func @transform_3(%arg0: i32, %arg1: i32) -> (i32, i32) {
    %c0_i32 = arith.constant 0 : i32
    %c0_i32_0 = arith.constant 0 : i32
    %c0_i32_1 = arith.constant 0 : i32
    return %c0_i32, %c0_i32_0 : i32, i32
  }
  func.func @transform_4(%arg0: i32, %arg1: i32) -> (i32, i32) {
    %c0_i32 = arith.constant 0 : i32
    %c0_i32_0 = arith.constant 0 : i32
    %c0_i32_1 = arith.constant 0 : i32
    return %c0_i32, %c0_i32_0 : i32, i32
  }
  func.func @transform_5(%arg0: i32, %arg1: i32) -> (i32, i32, i32, i32) {
    %c0_i32 = arith.constant 0 : i32
    %c0_i32_0 = arith.constant 0 : i32
    %c0_i32_1 = arith.constant 0 : i32
    return %arg0, %c0_i32, %arg1, %c0_i32_0 : i32, i32, i32, i32
  }
  func.func @transform_6(%arg0: i32, %arg1: i32) -> (i32, i32, i32, i32) {
    %c0_i32 = arith.constant 0 : i32
    %c0_i32_0 = arith.constant 0 : i32
    %c0_i32_1 = arith.constant 0 : i32
    return %arg0, %c0_i32, %arg1, %c0_i32_0 : i32, i32, i32, i32
  }
  func.func @transform_7(%arg0: i32, %arg1: i32) -> (i32, i32, i32, i32) {
    %c0_i32 = arith.constant 0 : i32
    %c0_i32_0 = arith.constant 0 : i32
    %c0_i32_1 = arith.constant 0 : i32
    return %arg0, %c0_i32, %arg1, %c0_i32_0 : i32, i32, i32, i32
  }
}

</mosaic_0001>

<bundles_post_ra>
// kernel: tpu_custom_call.1
= control target key start
LH: loop header
LB: loop body
LE: loop exit
PB: predicated region body
PF: predicated region fallthrough
CT: control target
= control target key end

     0   :  { %s2440_s0 = inlined_call_operand.hbm [shape: f32[2,8,256], index: 0, kind: input, shape index: {}]   ;;  %s2441_s1 = inlined_call_operand.hbm [shape: f32[1,256], index: 1, kind: input, shape index: {}]   ;;  %s2442_s2 = inlined_call_operand.hbm [shape: f32[1,256], index: 2, kind: input, shape index: {}]   ;;  %s2443_s3 = inlined_call_operand.hbm [shape: bf16[256,768], index: 3, kind: input, shape index: {}]   ;;  %s2444_s4 = inlined_call_operand.vmem [shape: f32[1,768], index: 4, kind: input, shape index: {}]   ;;  %s2445_s5 = inlined_call_operand.hbm [shape: bf16[2,2,8,128], index: 5, kind: output, shape index: {0}]   ;;  %s2446_s6 = inlined_call_operand.hbm [shape: bf16[2,2,8,128], index: 6, kind: output, shape index: {1}]   ;;  %s2447_s7 = inlined_call_operand.hbm [shape: bf16[2,2,8,128], index: 7, kind: output, shape index: {2}]  }
   0x1   :  { %2452 = sst [smem:[#allocation19_spill]] %s2440_s0 }
   0x2   :  { %2453 = sst [smem:[#allocation20_spill]] %s2441_s1 }
   0x3   :  { %2454 = sst [smem:[#allocation21_spill]] %s2442_s2 }
   0x4   :  { %2455 = sst [smem:[#allocation22_spill]] %s2443_s3 }
   0x5   :  { %13 = vsyncpa [#allocation3], 0 }
   0x6   :  { %15 = vsyncpa [#allocation3 + $0x1], 0 }
   0x7   :  { %16 = vsyncpa [#allocation6], 0 }
   0x8   :  { %17 = vsyncpa [#allocation9], 0 }
   0x9   :  { %18 = vsyncpa [#allocation4], 0 }
   0xa   :  { %20 = vsyncpa [#allocation4 + $0x1], 0 }
   0xb   :  { %21 = vsyncpa [#allocation12], 0 }
   0xc   :  { %23 = vsyncpa [#allocation12 + $0x1], 0  ;;  %s2099_s24 = smov 0   ;;  %s2101_s25 = smov 0  }
   0xd   :  { %s2103_s26 = smov 0   ;;  %s2105_s27 = smov 0  }
   0xe   :  { %s2107_s28 = smov 0   ;;  %s2109_s29 = smov 0  }
   0xf LB: > { %s2130_s30 = sadd.s32 4294967295, %s2046_s29   ;;  %s2451_s8 = sadd.s32 4294967294, %s2046_s29   ;;  %s2046_s29 = sphi %s2109_s29, %s29_s29   ;;  %s2042_s28 = sphi %s2107_s28, %s2480_s28   ;;  %s2038_s27 = sphi %s2105_s27, %s2479_s27   ;;  %s2034_s26 = sphi %s2103_s26, %s2478_s26   ;;  %s2030_s25 = sphi %s2101_s25, %s2477_s25   ;;  %s2026_s24 = sphi %s2099_s24, %s2476_s24  }
  0x10   : > { %p63_p0 = scmp.ne.s32.totalorder %s2030_s25, %s2026_s24  ;;  %p2448_p1 = scmp.eq.s32.totalorder %s2130_s30, 0 }
  0x11   : > { %p179_p3 = scmp.eq.s32.totalorder %s2451_s8, 1  ;;  %p1413_p5 = scmp.ge.s32.totalorder %s2046_s29, 1 }
  0x12   : > { %p2141_p4 = por %p2448_p1, %p63_p0  ;;  %p242_p7 = scmp.lt.s32.totalorder %s2046_s29, 3 }
  0x13   : > { %p2146_p6 = por %p179_p3, %p63_p0  ;;  %s2048_s12 = smov [#allocation5]  }
  0x14   : > { %s2456_s9 = scalar_select %p2141_p4, 1, 0 }
  0x15   : > { %s2457_s10 = scalar_select %p2146_p6, 1, 0 }
  0x16   : > { %p2151_p8 = pnand %p1413_p5, %p242_p7  ;;  %s255_s13 = sshll.u32 %s2048_s12, 4  ;;  %s256_s13 = int_to_ptr.vmem [resolvable:$true] %s255_s13 }
  0x17   : > { %s2049_s14 = smov [#allocation7]   ;;  %s2050_s17 = smov [#allocation8]  }
  0x18   : > { %s2458_s11 = scalar_select %p2151_p8, 1, 0 }
  0x19   : > { %p1563_p10 = pneg %p2151_p8  ;;  %s266_s15 = sshll.u32 %s2049_s14, 4  ;;  %s267_s15 = int_to_ptr.vmem [resolvable:$true] %s266_s15 }
  0x1a   : > { %s276_s18 = sshll.u32 %s2050_s17, 4  ;;  %s1807_s19 = scalar_lea.vmem %s256_s13, 32  ;;  %s2164_s18 = int_to_ptr.vmem [resolvable:$true] %s276_s18 }
  0x1b   : > { %p2160_p11 = pnand %p1563_p10, %p2448_p1  ;;  %p1808_p13 = scmp.ne.s32.totalorder %s256_s13, %s1807_s19 }
  0x1c   : > { %p1815_p5 = scmp.lt.s32.totalorder %s256_s13, %s256_s13  ;;  %p1816_p7 = scmp.lt.s32.totalorder %s1807_s19, %s1807_s19 }
  0x1d   : > { %p1798_p12 = pneg %p2160_p11 }
  0x1e   : > { %p1817_p10 = por %p1816_p7, %p1815_p5 }
  0x1f   : > { %p1810_p0 = pnand %p1808_p13, %p1798_p12 }
  0x21   : > { %p1811_p3 = pneg %p1810_p0 }
  0x23   : > { %p1818_p9 = pnand %p1817_p10, %p1811_p3 }
  0x25   : > { %1821 = shalt.err (!%p1818_p9)
}
  0x26   : > { %s2460_s1 = sld [smem:[#allocation20_spill]]  ;;  %s1833_s22 = scalar_lea.vmem %s267_s15, 32 }
  0x27   : > { %p1834_p1 = scmp.ne.s32.totalorder %s267_s15, %s1833_s22  ;;  %p1841_p13 = scmp.lt.s32.totalorder %s267_s15, %s267_s15 }
  0x28   : > { %p1842_p0 = scmp.lt.s32.totalorder %s1833_s22, %s1833_s22 }
  0x29   : > { %p1836_p2 = pnand %p1834_p1, %p1798_p12 }
  0x2a   : > { %p1843_p4 = por %p1842_p0, %p1841_p13 }
  0x2b   : > { %p1837_p6 = pneg %p1836_p2 }
  0x2c   : > { %1566 = dma.hbm_to_vmem [thread:$0]  (!%p2160_p11), %s2460_s1, 32, %s256_s13, [#allocation6]  }
  0x2d   : > { %p1844_p8 = pnand %p1843_p4, %p1837_p6 }
  0x2f   : > { %1847 = shalt.err (!%p1844_p8)
}
  0x30   : > { %s2461_s2 = sld [smem:[#allocation21_spill]]  ;;  %s1859_s13 = scalar_lea.vmem %s2164_s18, 12288 }
  0x31   : > { %p1860_p9 = scmp.ne.s32.totalorder %s2164_s18, %s1859_s13  ;;  %p1867_p3 = scmp.lt.s32.totalorder %s2164_s18, %s2164_s18 }
  0x32   : > { %p1868_p4 = scmp.lt.s32.totalorder %s1859_s13, %s1859_s13 }
  0x33   : > { %p1862_p1 = pnand %p1860_p9, %p1798_p12 }
  0x34   : > { %p1869_p6 = por %p1868_p4, %p1867_p3 }
  0x35   : > { %p1863_p2 = pneg %p1862_p1 }
  0x36   : > { %1569 = dma.hbm_to_vmem [thread:$0]  (!%p2160_p11), %s2461_s2, 32, %s267_s15, [#allocation6]  }
  0x37   : > { %p1870_p8 = pnand %p1869_p6, %p1863_p2 }
  0x39   : > { %1873 = shalt.err (!%p1870_p8)
}
  0x3a   : > { %s2051_s14 = smov 384   ;;  %s2052_s15 = smov 24  }
  0x3b   : > { %s2462_s3 = sld [smem:[#allocation22_spill]]  ;;  %s50_s20 = sadd.s32 1, %s2034_s26 }
  0x3c   : > { %s41_s21 = sadd.s32 1, %s2042_s28  ;;  %p57_p12 = scmp.ne.s32.totalorder %s2034_s26, %s2030_s25 }
  0x3d   : > { %p43_p5 = scmp.ge.s32.totalorder %s41_s21, 2  ;;  %p58_p7 = scmp.eq.s32.totalorder %s2046_s29, 0 }
  0x3e   : > { %p2463_p10 = scmp.eq.s32.totalorder %s2130_s30, 1  ;;  %p1590_p0 = scmp.lt.s32.totalorder %s2046_s29, 2 }
  0x3f   : > { %s2482_s21 = smov (%p43_p5, %s41_s21), 0  ;;  %p59_p9 = por %p58_p7, %p57_p12 }
  0x40   : > { %p2204_p13 = por %p2463_p10, %p57_p12  ;;  %s293_s16 = sand.u32 1, %s2034_s26  }
  0x41   : > { %1572 = dma.hbm_to_vmem [thread:$0]  (!%p2160_p11), %s2462_s3, 12288, %s2164_s18, [#allocation9], %s2051_s14, %s2051_s14, %s2052_s15  }
  0x42   : > { %s45_s23 = ssub.s32 %s2042_s28, %s2482_s21  ;;  %s1418_s18 = sshll.u32 %s293_s16, 4 }
  0x43   : > { %p48_p1 = scmp.eq.s32.totalorder %s45_s23, 0  ;;  %s1539_s12 = sshll.u32 %s2042_s28, 8 }
  0x44   : > { %s2465_s0 = sld [smem:[#allocation19_spill]]  ;;  %s297_s19 = scalar_lea.vmem [#allocation2], %s1418_s18 }
  0x45   : > { %s2216_s13 = scalar_select %p48_p1, %s2034_s26, %s50_s20  }
  0x46   : > { %s307_s8 = sshll.u32 %s297_s19, 4  ;;  %p2223_p11 = pnand %p1590_p0, %p59_p9  ;;  %s308_s8 = int_to_ptr.vmem [resolvable:$true] %s307_s8 }
  0x47   : > { %s294_s2 = scalar_lea.sflag [#allocation3], %s293_s16  ;;  %s1887_s23 = scalar_lea.vmem %s308_s8, 256 }
  0x48   : > { %p1876_p2 = pneg %p2223_p11  ;;  %p1888_p3 = scmp.ne.s32.totalorder %s308_s8, %s1887_s23 }
  0x49   : > { %s2053_s20 = smov [#allocation2]  }
  0x4a   : > { %s305_s17 = scalar_lea.hbm %s2465_s0, %s1539_s12  ;;  %p1890_p4 = pnand %p1888_p3, %p1876_p2 }
  0x4b   : > { %s1892_s3 = sshll.u32 %s2053_s20, 4  ;;  %s1893_s3 = int_to_ptr.vmem [resolvable:$false] %s1892_s3 }
  0x4c   : > { %p1891_p6 = pneg %p1890_p4  ;;  %s1894_s12 = scalar_lea.vmem %s1893_s3, 512 }
  0x4d   : > { %p1895_p8 = scmp.lt.s32.totalorder %s308_s8, %s1893_s3  ;;  %p1896_p12 = scmp.lt.s32.totalorder %s1894_s12, %s1887_s23 }
  0x4f   : > { %p1897_p5 = por %p1896_p12, %p1895_p8 }
  0x51   : > { %p1898_p7 = pnand %p1897_p5, %p1891_p6 }
  0x53   : > { %1901 = shalt.err (!%p1898_p7)
}
  0x54   : > { %1576 = dma.hbm_to_vmem [thread:$0]  (!%p2223_p11), %s305_s17, 256, %s308_s8, %s294_s2  }
  0x55   : > { %p2467_p10 = scmp.ne.s32.totalorder %s2458_s11, 0 }
  0x56   : > { %s2234_s16 = sand.u32 (!%p2467_p10), 1, %s2030_s25   ;;  %p2468_p0 = scmp.ne.s32.totalorder (!%p2467_p10), %s2456_s9, 0 }
  0x57   : > { %316 = sbr.rel (%p2467_p10) target bundleno = 690 (0x2b2), region = 40  ;;  %s1422_s18 = sshll.u32 (!%p2467_p10), %s2234_s16, 4 }
  0x58   : > { %s319_s14 = scalar_lea.sflag (!%p2467_p10), [#allocation3], %s2234_s16  ;;  %s322_s15 = scalar_lea.vmem (!%p2467_p10), [#allocation2], %s1422_s18 }
  0x5c   : > { %2005 = dma.done.wait (%p2468_p0), %s319_s14, 256  }
  0x5d   : > { %2007 = vsyncadd (%p2468_p0), %s319_s14, 4294967040  ;;  %p2469_p9 = scmp.eq.s32.totalorder %s2130_s30, 0 }
  0x5f   : > { %2009 = dma.done.wait (%p2469_p9), [#allocation6], 64   ;;  %p2470_p1 = pmov %p2469_p9 }
  0x61   : > { %2011 = vsyncadd (%p2470_p1), [#allocation6], 4294967232  ;;  %p2471_p11 = pmov %p2470_p1 }
  0x62   : > { %p2472_p2 = pmov %p2470_p1 }
  0x63   : > { %2013 = dma.done.wait (%p2471_p11), [#allocation9], 12288  }
  0x64   : > { %2015 = vsyncadd (%p2472_p2), [#allocation9], 4294955008  ;;  %v2250_v0 = vld [vmem:[%s322_s15] sm:$0xff]  ;;  %v2252_v1 = vld [vmem:[%s322_s15 + $0x8] sm:$0xff]  ;;  %s2293_s3 = sshll.u32 %s2234_s16, 3  ;;  %s1177_s11 = sand.u32 1, %s2130_s30  }
  0x65   : > { %v379_v2 = vadd.f32 %v2252_v1, %v2250_v0  ;;  %v1650_v3 = vld [vmem:[#allocation8 + $0x154] ss:$24 sps:$4 sm:$0xff]   ;;  %v1652_v4 = vld [vmem:[#allocation8 + $0x150] ss:$24 sps:$4 sm:$0xff]   ;;  %v1656_v7 = vld [vmem:[#allocation8 + $0x124] ss:$24 sps:$4 sm:$0xff]  }
  0x66   : > { %v1653_v5 = vld [vmem:[#allocation8 + $0x15c] ss:$24 sps:$4 sm:$0xff]   ;;  %v1655_v6 = vld [vmem:[#allocation8 + $0x158] ss:$24 sps:$4 sm:$0xff]   ;;  %1032 = vmatprep.subr.bf16.mxu0 %v1650_v3  ;;  %v1659_v8 = vld [vmem:[#allocation8 + $0x12c] ss:$24 sps:$4 sm:$0xff]  }
  0x67   : > { %380 = vadd.xlane.f32.xlu0 %v379_v2  ;;  %1073 = vmatprep.subr.bf16.mxu1 %v1653_v5  ;;  %v1658_v9 = vld [vmem:[#allocation8 + $0x120] ss:$24 sps:$4 sm:$0xff]   ;;  %v1662_v11 = vld [vmem:[#allocation8 + $0xf4] ss:$24 sps:$4 sm:$0xff]   ;;  %v1664_v13 = vld [vmem:[#allocation8 + $0xf0] ss:$24 sps:$4 sm:$0xff]  }
  0x68   : > { %1033 = vmatpush1.bf16.msra.mxu0 %v1652_v4  ;;  %1074 = vmatpush1.bf16.msra.mxu1 %v1655_v6  ;;  %v1661_v10 = vld [vmem:[#allocation8 + $0x128] ss:$24 sps:$4 sm:$0xff]   ;;  %v1665_v12 = vld [vmem:[#allocation8 + $0xfc] ss:$24 sps:$4 sm:$0xff]   ;;  %v1667_v14 = vld [vmem:[#allocation8 + $0xf8] ss:$24 sps:$4 sm:$0xff]  }
  0x69   : > { %1034 = vmatprep.subr.bf16.mxu0 %v1656_v7  ;;  %1075 = vmatprep.subr.bf16.mxu1 %v1659_v8  ;;  %v1668_v15 = vld [vmem:[#allocation8 + $0xc4] ss:$24 sps:$4 sm:$0xff]   ;;  %v1670_v17 = vld [vmem:[#allocation8 + $0xc0] ss:$24 sps:$4 sm:$0xff]   ;;  %v1674_v19 = vld [vmem:[#allocation8 + $0x94] ss:$24 sps:$4 sm:$0xff]  }
  0x6a   : > { %v1671_v16 = vld [vmem:[#allocation8 + $0xcc] ss:$24 sps:$4 sm:$0xff]   ;;  %v1673_v18 = vld [vmem:[#allocation8 + $0xc8] ss:$24 sps:$4 sm:$0xff]   ;;  %v1677_v20 = vld [vmem:[#allocation8 + $0x9c] ss:$24 sps:$4 sm:$0xff]  }
  0x6b   : > { %v1676_v21 = vld [vmem:[#allocation8 + $0x90] ss:$24 sps:$4 sm:$0xff]   ;;  %v1680_v23 = vld [vmem:[#allocation8 + $0x64] ss:$24 sps:$4 sm:$0xff]   ;;  %v1682_v25 = vld [vmem:[#allocation8 + $0x60] ss:$24 sps:$4 sm:$0xff]  }
  0x6c   : > { %1035 = vmatpush1.bf16.msra.mxu0 %v1658_v9  ;;  %1076 = vmatpush1.bf16.msra.mxu1 %v1661_v10  ;;  %v1679_v22 = vld [vmem:[#allocation8 + $0x98] ss:$24 sps:$4 sm:$0xff]   ;;  %v1683_v24 = vld [vmem:[#allocation8 + $0x6c] ss:$24 sps:$4 sm:$0xff]   ;;  %v1685_v26 = vld [vmem:[#allocation8 + $0x68] ss:$24 sps:$4 sm:$0xff]  }
  0x6d   : > { %1036 = vmatprep.subr.bf16.mxu0 %v1662_v11  ;;  %1077 = vmatprep.subr.bf16.mxu1 %v1665_v12  ;;  %v1686_v27 = vld [vmem:[#allocation8 + $0x34] ss:$24 sps:$4 sm:$0xff]   ;;  %v1688_v29 = vld [vmem:[#allocation8 + $0x30] ss:$24 sps:$4 sm:$0xff]   ;;  %v1692_v31 = vld [vmem:[#allocation8 + $0x4] ss:$24 sps:$4 sm:$0xff]  }
  0x6e   : > { %v1689_v28 = vld [vmem:[#allocation8 + $0x3c] ss:$24 sps:$4 sm:$0xff]   ;;  %v1691_v30 = vld [vmem:[#allocation8 + $0x38] ss:$24 sps:$4 sm:$0xff]   ;;  %v1695_v32 = vld [vmem:[#allocation8 + $0xc] ss:$24 sps:$4 sm:$0xff]  }
  0x6f   : > { %v1694_v33 = vld [vmem:[#allocation8] ss:$24 sps:$4 sm:$0xff]   ;;  %v1698_v35 = vld [vmem:[#allocation8 + $0x2d4] ss:$24 sps:$4 sm:$0xff]   ;;  %v1700_v37 = vld [vmem:[#allocation8 + $0x2d0] ss:$24 sps:$4 sm:$0xff]  }
  0x70   : > { %1037 = vmatpush1.bf16.msra.mxu0 %v1664_v13  ;;  %1078 = vmatpush1.bf16.msra.mxu1 %v1667_v14  ;;  %v1697_v34 = vld [vmem:[#allocation8 + $0x8] ss:$24 sps:$4 sm:$0xff]   ;;  %v1701_v36 = vld [vmem:[#allocation8 + $0x2dc] ss:$24 sps:$4 sm:$0xff]   ;;  %v1703_v38 = vld [vmem:[#allocation8 + $0x2d8] ss:$24 sps:$4 sm:$0xff]   ;;  %v397_v14 = vlaneseq }
  0x71   : > { %1038 = vmatprep.subr.bf16.mxu0 %v1668_v15  ;;  %1079 = vmatprep.subr.bf16.mxu1 %v1671_v16  ;;  %v1704_v39 = vld [vmem:[#allocation8 + $0x2a4] ss:$24 sps:$4 sm:$0xff]   ;;  %v1706_v41 = vld [vmem:[#allocation8 + $0x2a0] ss:$24 sps:$4 sm:$0xff]   ;;  %v1710_v50 = vld [vmem:[#allocation8 + $0x274] ss:$24 sps:$4 sm:$0xff]  }
  0x72   : > { %v1707_v40 = vld [vmem:[#allocation8 + $0x2ac] ss:$24 sps:$4 sm:$0xff]   ;;  %v1709_v49 = vld [vmem:[#allocation8 + $0x2a8] ss:$24 sps:$4 sm:$0xff]   ;;  %v1713_v52 = vld [vmem:[#allocation8 + $0x27c] ss:$24 sps:$4 sm:$0xff]  }
  0x73   : > { %v1712_v51 = vld [vmem:[#allocation8 + $0x270] ss:$24 sps:$4 sm:$0xff]   ;;  %v1716_v54 = vld [vmem:[#allocation8 + $0x244] ss:$24 sps:$4 sm:$0xff]   ;;  %v1718_v55 = vld [vmem:[#allocation8 + $0x240] ss:$24 sps:$4 sm:$0xff]  }
  0x74   : > { %1039 = vmatpush1.bf16.msra.mxu0 %v1670_v17  ;;  %1080 = vmatpush1.bf16.msra.mxu1 %v1673_v18  ;;  %v1715_v53 = vld [vmem:[#allocation8 + $0x278] ss:$24 sps:$4 sm:$0xff]   ;;  %v1719_v56 = vld [vmem:[#allocation8 + $0x24c] ss:$24 sps:$4 sm:$0xff]   ;;  %v1721_v57 = vld [vmem:[#allocation8 + $0x248] ss:$24 sps:$4 sm:$0xff]  }
  0x75   : > { %1040 = vmatprep.subr.bf16.mxu0 %v1674_v19  ;;  %1081 = vmatprep.subr.bf16.mxu1 %v1677_v20  ;;  %v1722_v58 = vld [vmem:[#allocation8 + $0x214] ss:$24 sps:$4 sm:$0xff]   ;;  %v1724_v60 = vld [vmem:[#allocation8 + $0x210] ss:$24 sps:$4 sm:$0xff]   ;;  %v1728_v62 = vld [vmem:[#allocation8 + $0x1e4] ss:$24 sps:$4 sm:$0xff]  }
  0x76   : > { %v1725_v59 = vld [vmem:[#allocation8 + $0x21c] ss:$24 sps:$4 sm:$0xff]   ;;  %v1727_v61 = vld [vmem:[#allocation8 + $0x218] ss:$24 sps:$4 sm:$0xff]   ;;  %v1731_v63 = vld [vmem:[#allocation8 + $0x1ec] ss:$24 sps:$4 sm:$0xff]  }
  0x77   : > { %v1734_v2 = vld [vmem:[#allocation8 + $0x1b4] ss:$24 sps:$4 sm:$0xff]   ;;  %v1736_v4 = vld [vmem:[#allocation8 + $0x1b0] ss:$24 sps:$4 sm:$0xff]   ;;  %v1740_v6 = vld [vmem:[#allocation8 + $0x184] ss:$24 sps:$4 sm:$0xff]  }
  0x78   : > { %1041 = vmatpush1.bf16.msra.mxu0 %v1676_v21  ;;  %1082 = vmatpush1.bf16.msra.mxu1 %v1679_v22  ;;  %v1737_v3 = vld [vmem:[#allocation8 + $0x1bc] ss:$24 sps:$4 sm:$0xff]   ;;  %v1739_v5 = vld [vmem:[#allocation8 + $0x1b8] ss:$24 sps:$4 sm:$0xff]   ;;  %v1743_v7 = vld [vmem:[#allocation8 + $0x18c] ss:$24 sps:$4 sm:$0xff]  }
  0x79   : > { %1042 = vmatprep.subr.bf16.mxu0 %v1680_v23  ;;  %1083 = vmatprep.subr.bf16.mxu1 %v1683_v24  ;;  %v1742_v8 = vld [vmem:[#allocation8 + $0x180] ss:$24 sps:$4 sm:$0xff]   ;;  %v1748_v10 = vld [vmem:[#allocation8 + $0x164] ss:$24 sps:$4 sm:$0xff]   ;;  %v2266_v15 = vshrl.u32 %v397_v14, 7  ;;  %s367_s8 = scalar_lea.vmem [#allocation11], %s2293_s3 }
  0x7a   : > { %v1745_v9 = vld [vmem:[#allocation8 + $0x188] ss:$24 sps:$4 sm:$0xff]   ;;  %v377_v18 = vld [vmem:[#allocation5] sm:$0x3]  ;;  %v378_v19 = vld [vmem:[#allocation7] sm:$0x3] }
  0x7b   : > { %v2269_v16 = vsub.s32 1, %v2266_v15  ;;  %v2272_v17 = vsub.s32 0, %v2266_v15  ;;  %s1214_s9 = sshll.u32 %s367_s8, 4  ;;  %s2304_s17 = sshll.u32 %s2038_s27, 7  ;;  %s2310_s9 = int_to_ptr.vmem [resolvable:$true] %s1214_s9 }
  0x7c   : > { %1043 = vmatpush1.bf16.msra.mxu0 %v1682_v25  ;;  %1084 = vmatpush1.bf16.msra.mxu1 %v1685_v26  ;;  %s2307_s19 = scalar_lea.vmem [#allocation10], %s2293_s3  ;;  %s2316_s20 = scalar_lea.hbm %s2446_s6, %s2304_s17 }
  0x7d   : > { %1044 = vmatprep.subr.bf16.mxu0 %v1686_v27  ;;  %1085 = vmatprep.subr.bf16.mxu1 %v1689_v28  ;;  %v404_v20 = vrot.slane %v377_v18, %v2269_v16  ;;  %v400_v21 = vrot.slane %v377_v18, %v2272_v17  ;;  %v417_v24 = vrot.slane %v378_v19, %v2269_v16  ;;  %s1197_s23 = sshll.u32 %s2307_s19, 4  ;;  %s2325_s14 = scalar_lea.hbm %s2445_s5, %s2304_s17  ;;  %s2318_s23 = int_to_ptr.vmem [resolvable:$true] %s1197_s23 }
  0x7e   : > { %v413_v26 = vrot.slane %v378_v19, %v2272_v17  ;;  %s2327_s15 = scalar_lea.sflag [#allocation12], %s1177_s11  ;;  %s1902_s1 = scalar_lea.vmem %s2310_s9, 128 }
  0x7f   : > { %p1903_p3 = scmp.ne.s32.totalorder %s2310_s9, %s1902_s1  ;;  %s2054_s2 = smov [#allocation11]  }
  0x80   : > { %1045 = vmatpush1.bf16.msra.mxu0 %v1688_v29  ;;  %1086 = vmatpush1.bf16.msra.mxu1 %v1691_v30  ;;  %s1906_s27 = sshll.u32 %s2054_s2, 4  ;;  %s1907_s27 = int_to_ptr.vmem [resolvable:$false] %s1906_s27 }
  0x81   : > { %1046 = vmatprep.subr.bf16.mxu0 %v1692_v31  ;;  %1087 = vmatprep.subr.bf16.mxu1 %v1695_v32  ;;  %v1746_v32 = vld [vmem:[#allocation8 + $0x160] ss:$24 sps:$4 sm:$0xff]   ;;  %p1904_p4 = pnand %p1903_p3, %p2204_p13  ;;  %s1908_s30 = scalar_lea.vmem %s1907_s27, 256 }
  0x82   : > { %p1909_p8 = scmp.lt.s32.totalorder %s2310_s9, %s1907_s27  ;;  %p1910_p12 = scmp.lt.s32.totalorder %s1908_s30, %s1902_s1 }
  0x83   : > { %p1905_p6 = pneg %p1904_p4 }
  0x84   : > { %1047 = vmatpush1.bf16.msra.mxu0 %v1694_v33  ;;  %1088 = vmatpush1.bf16.msra.mxu1 %v1697_v34  ;;  %v1751_v34 = vld [vmem:[#allocation8 + $0x134] ss:$24 sps:$4 sm:$0xff]   ;;  %p1911_p5 = por %p1910_p12, %p1909_p8 }
  0x85   : > { %1048 = vmatprep.subr.bf16.mxu0 %v1698_v35  ;;  %1089 = vmatprep.subr.bf16.mxu1 %v1701_v36  ;;  %v1749_v35 = vld [vmem:[#allocation8 + $0x130] ss:$24 sps:$4 sm:$0xff]   ;;  %v1754_v36 = vld [vmem:[#allocation8 + $0x104] ss:$24 sps:$4 sm:$0xff]  }
  0x86   : > { %p1912_p7 = pnand %p1911_p5, %p1905_p6 }
  0x88   : > { %1049 = vmatpush2.bf16.msra.mxu0 %v1700_v37  ;;  %1090 = vmatpush2.bf16.msra.mxu1 %v1703_v38  ;;  %v1752_v37 = vld [vmem:[#allocation8 + $0x100] ss:$24 sps:$4 sm:$0xff]   ;;  %v1757_v38 = vld [vmem:[#allocation8 + $0xd4] ss:$24 sps:$4 sm:$0xff]  }
  0x89   : > { %1050 = vmatprep.subr.bf16.mxu0 %v1704_v39  ;;  %1091 = vmatprep.subr.bf16.mxu1 %v1707_v40  ;;  %v1755_v39 = vld [vmem:[#allocation8 + $0xd0] ss:$24 sps:$4 sm:$0xff]   ;;  %v1760_v40 = vld [vmem:[#allocation8 + $0xa4] ss:$24 sps:$4 sm:$0xff]  }
  0x8c   : > { %1051 = vmatpush2.bf16.msra.mxu0 %v1706_v41  ;;  %1092 = vmatpush2.bf16.msra.mxu1 %v1709_v49  ;;  %v1758_v41 = vld [vmem:[#allocation8 + $0xa0] ss:$24 sps:$4 sm:$0xff]  }
  0x8d   : > { %1052 = vmatprep.subr.bf16.mxu0 %v1710_v50  ;;  %1093 = vmatprep.subr.bf16.mxu1 %v1713_v52  ;;  %v1770_v49 = vld [vmem:[#allocation8 + $0x2e0] ss:$24 sps:$4 sm:$0xff]   ;;  %v1775_v50 = vld [vmem:[#allocation8 + $0x2b4] ss:$24 sps:$4 sm:$0xff]   ;;  %v1778_v52 = vld [vmem:[#allocation8 + $0x284] ss:$24 sps:$4 sm:$0xff]  }
  0x90   : > { %1053 = vmatpush2.bf16.msra.mxu0 %v1712_v51  ;;  %1094 = vmatpush2.bf16.msra.mxu1 %v1715_v53  ;;  %v1773_v51 = vld [vmem:[#allocation8 + $0x2b0] ss:$24 sps:$4 sm:$0xff]   ;;  %v1776_v53 = vld [vmem:[#allocation8 + $0x280] ss:$24 sps:$4 sm:$0xff]  }
  0x91   : > { %1054 = vmatprep.subr.bf16.mxu0 %v1716_v54  ;;  %1095 = vmatprep.subr.bf16.mxu1 %v1719_v56  ;;  %v1781_v54 = vld [vmem:[#allocation8 + $0x254] ss:$24 sps:$4 sm:$0xff]   ;;  %v1784_v56 = vld [vmem:[#allocation8 + $0x224] ss:$24 sps:$4 sm:$0xff]  }
  0x94   : > { %1055 = vmatpush2.bf16.msra.mxu0 %v1718_v55  ;;  %1096 = vmatpush2.bf16.msra.mxu1 %v1721_v57  ;;  %v1779_v55 = vld [vmem:[#allocation8 + $0x250] ss:$24 sps:$4 sm:$0xff]   ;;  %v1782_v57 = vld [vmem:[#allocation8 + $0x220] ss:$24 sps:$4 sm:$0xff]  }
  0x95   : > { %1056 = vmatprep.subr.bf16.mxu0 %v1722_v58  ;;  %1097 = vmatprep.subr.bf16.mxu1 %v1725_v59  ;;  %v1787_v58 = vld [vmem:[#allocation8 + $0x1f4] ss:$24 sps:$4 sm:$0xff]   ;;  %v1785_v59 = vld [vmem:[#allocation8 + $0x1f0] ss:$24 sps:$4 sm:$0xff]  }
  0x98   : > { %1057 = vmatpush2.bf16.msra.mxu0 %v1724_v60  ;;  %1098 = vmatpush2.bf16.msra.mxu1 %v1727_v61  ;;  %v1790_v60 = vld [vmem:[#allocation8 + $0x1c4] ss:$24 sps:$4 sm:$0xff]   ;;  %v1788_v61 = vld [vmem:[#allocation8 + $0x1c0] ss:$24 sps:$4 sm:$0xff]  }
  0x99   : > { %1058 = vmatprep.subr.bf16.mxu0 %v1728_v62  ;;  %1099 = vmatprep.subr.bf16.mxu1 %v1731_v63  ;;  %v1793_v62 = vld [vmem:[#allocation8 + $0x194] ss:$24 sps:$4 sm:$0xff]   ;;  %v1791_v63 = vld [vmem:[#allocation8 + $0x190] ss:$24 sps:$4 sm:$0xff]  }
  0xf0   : > { %v381_v42 = vpop.xlane.xlu0 %380 }
  0xf1   : > { %v383_v43 = vmul.f32 0.00390625, %v381_v42  ;;  %v1763_v42 = vld [vmem:[#allocation8 + $0x74] ss:$24 sps:$4 sm:$0xff]  }
  0xf3   : > { %v2257_v44 = vsub.f32 %v2250_v0, %v383_v43  ;;  %v2260_v45 = vsub.f32 %v2252_v1, %v383_v43  ;;  %v1730_v0 = vld [vmem:[#allocation8 + $0x1e0] ss:$24 sps:$4 sm:$0xff]   ;;  %v1761_v43 = vld [vmem:[#allocation8 + $0x70] ss:$24 sps:$4 sm:$0xff]  }
  0xf4   : > { %v1733_v1 = vld [vmem:[#allocation8 + $0x1e8] ss:$24 sps:$4 sm:$0xff]   ;;  %1059 = vmatpush2.bf16.msra.mxu0 %v1730_v0  ;;  %v532_v0 = vsub.s32 2, %v2266_v15 }
  0xf5   : > { %v386_v46 = vmul.f32 %v2257_v44, %v2257_v44  ;;  %v387_v47 = vmul.f32 %v2260_v45, %v2260_v45  ;;  %1100 = vmatpush2.bf16.msra.mxu1 %v1733_v1  ;;  %1060 = vmatprep.subr.bf16.mxu0 %v1734_v2  ;;  %v2289_v1 = vld [vmem:[%s2444_s4] sm:$0x3f]  ;;  %v536_v2 = vsub.s32 3, %v2266_v15 }
  0xf6   : > { %1101 = vmatprep.subr.bf16.mxu1 %v1737_v3  ;;  %v525_v3 = vrot.slane %v2289_v1, %v2272_v17 }
  0xf7   : > { %v388_v48 = vadd.f32 %v387_v47, %v386_v46  ;;  %v1769_v46 = vld [vmem:[#allocation8 + $0x14] ss:$24 sps:$4 sm:$0xff]   ;;  %v1767_v47 = vld [vmem:[#allocation8 + $0x10] ss:$24 sps:$4 sm:$0xff]  }
  0xf8   : > { %1061 = vmatpush2.bf16.msra.mxu0 %v1736_v4  ;;  %v533_v4 = vrot.slane %v2289_v1, %v532_v0 }
  0xf9   : > { %389 = vadd.xlane.f32.xlu0 %v388_v48  ;;  %1102 = vmatpush2.bf16.msra.mxu1 %v1739_v5  ;;  %v1772_v48 = vld [vmem:[#allocation8 + $0x2e4] ss:$24 sps:$4 sm:$0xff]   ;;  %v529_v5 = vrot.slane %v2289_v1, %v2269_v16 }
  0xfa   : > { %1062 = vmatprep.subr.bf16.mxu0 %v1740_v6  ;;  %1103 = vmatprep.subr.bf16.mxu1 %v1743_v7  ;;  %v537_v6 = vrot.slane %v2289_v1, %v536_v2 }
  0xfc   : > { %1063 = vmatpush2.bf16.msra.mxu0 %v1742_v8 }
  0xfd   : > { %1104 = vmatpush2.bf16.msra.mxu1 %v1745_v9  ;;  %1114 = vmatprep.subr.bf16.mxu0 %v1748_v10 }
 0x182   : > { %v390_v11 = vpop.xlane.xlu0 %389 }
 0x183   : > { %v391_v12 = vmul.f32 0.00390625, %v390_v11 }
 0x185   : > { %v392_v13 = vadd.f32 1e-05, %v391_v12 }
 0x187   : > { %1794 = vrsqrt.f32 %v392_v13 }
 0x194   : > { %v1795_v22 = vpop.eup %1794 }
 0x195   : > { %v395_v23 = vmul.f32 %v1795_v22, %v2260_v45  ;;  %v394_v25 = vmul.f32 %v1795_v22, %v2257_v44  ;;  %v1766_v44 = vld [vmem:[#allocation8 + $0x44] ss:$24 sps:$4 sm:$0xff]   ;;  %v1764_v45 = vld [vmem:[#allocation8 + $0x40] ss:$24 sps:$4 sm:$0xff]  }
 0x197   : > { %v408_v27 = vmul.f32 %v404_v20, %v395_v23  ;;  %v407_v28 = vmul.f32 %v400_v21, %v394_v25 }
 0x199   : > { %v421_v29 = vadd.f32 %v417_v24, %v408_v27  ;;  %v420_v30 = vadd.f32 %v413_v26, %v407_v28 }
 0x19b   : > { %v423_v31 = vpack.c.bf16 %v421_v29, %v421_v29  ;;  %v2280_v33 = vpack.c.bf16 %v420_v30, %v420_v30 }
 0x19d   : > { %1064 = vmatprep.mubr.bf16.mxu0 %v423_v31  ;;  %1105 = vmatprep.mubr.bf16.mxu1 %v423_v31 }
 0x19e   : > { %1065 = vmatmul.mubr.bf16.vlgmr.msra.gmra.mxu0 %v2280_v33  ;;  %1106 = vmatmul.mubr.bf16.vlgmr.msra.gmra.mxu1 %v2280_v33 }
 0x19f   : > { %1115 = vmatpush1.bf16.msra.mxu0 %v1746_v32  ;;  %1146 = vmatprep.mubr.bf16.mxu0 %v423_v31 }
 0x1a0   : > { %1116 = vmatprep.subr.bf16.mxu0 %v1751_v34 }
 0x1a3   : > { %1117 = vmatpush1.bf16.msra.mxu0 %v1749_v35 }
 0x1a4   : > { %1118 = vmatprep.subr.bf16.mxu0 %v1754_v36 }
 0x1a7   : > { %1119 = vmatpush1.bf16.msra.mxu0 %v1752_v37 }
 0x1a8   : > { %1120 = vmatprep.subr.bf16.mxu0 %v1757_v38 }
 0x1ab   : > { %1121 = vmatpush1.bf16.msra.mxu0 %v1755_v39 }
 0x1ac   : > { %1122 = vmatprep.subr.bf16.mxu0 %v1760_v40 }
 0x1af   : > { %1123 = vmatpush1.bf16.msra.mxu0 %v1758_v41 }
 0x1b0   : > { %1124 = vmatprep.subr.bf16.mxu0 %v1763_v42 }
 0x1b3   : > { %1125 = vmatpush1.bf16.msra.mxu0 %v1761_v43 }
 0x1b4   : > { %1126 = vmatprep.subr.bf16.mxu0 %v1766_v44 }
 0x1b7   : > { %1127 = vmatpush1.bf16.msra.mxu0 %v1764_v45 }
 0x1b8   : > { %1128 = vmatprep.subr.bf16.mxu0 %v1769_v46 }
 0x1bb   : > { %1129 = vmatpush1.bf16.msra.mxu0 %v1767_v47 }
 0x1bc   : > { %1130 = vmatprep.subr.bf16.mxu0 %v1772_v48 }
 0x1bf   : > { %1131 = vmatpush2.bf16.msra.mxu0 %v1770_v49 }
 0x1c0   : > { %1132 = vmatprep.subr.bf16.mxu0 %v1775_v50 }
 0x1c3   : > { %1133 = vmatpush2.bf16.msra.mxu0 %v1773_v51 }
 0x1c4   : > { %1134 = vmatprep.subr.bf16.mxu0 %v1778_v52 }
 0x1c7   : > { %1135 = vmatpush2.bf16.msra.mxu0 %v1776_v53 }
 0x1c8   : > { %1136 = vmatprep.subr.bf16.mxu0 %v1781_v54 }
 0x1cb   : > { %1137 = vmatpush2.bf16.msra.mxu0 %v1779_v55 }
 0x1cc   : > { %1138 = vmatprep.subr.bf16.mxu0 %v1784_v56 }
 0x1cf   : > { %1139 = vmatpush2.bf16.msra.mxu0 %v1782_v57 }
 0x1d0   : > { %1140 = vmatprep.subr.bf16.mxu0 %v1787_v58 }
 0x1d3   : > { %1141 = vmatpush2.bf16.msra.mxu0 %v1785_v59 }
 0x1d4   : > { %1142 = vmatprep.subr.bf16.mxu0 %v1790_v60 }
 0x1d7   : > { %1143 = vmatpush2.bf16.msra.mxu0 %v1788_v61 }
 0x1d8   : > { %1144 = vmatprep.subr.bf16.mxu0 %v1793_v62 }
 0x1db   : > { %1145 = vmatpush2.bf16.msra.mxu0 %v1791_v63 }
 0x1de   : > { %1147 = vmatmul.mubr.bf16.vlgmr.msra.gmra.mxu0 %v2280_v33 }
 0x25e   : > { %v1066_v7 = vpop.f32.mrf.mxu0  ;;  %v1107_v8 = vpop.f32.mrf.mxu1 }
 0x25f   : > { %v1067_v9 = vadd.f32 %v1066_v7, %v525_v3  ;;  %v1108_v10 = vadd.f32 %v1107_v8, %v533_v4 }
 0x260   : > { %v1068_v11 = vpop.f32.mrf.mxu0  ;;  %v1109_v12 = vpop.f32.mrf.mxu1 }
 0x261   : > { %v1155_v13 = vmul.f32 0.088388346, %v1067_v9  ;;  %v1158_v14 = vpack.c.bf16 %v1108_v10, %v1108_v10  ;;  %v1069_v16 = vadd.f32 %v1068_v11, %v529_v5  ;;  %v1110_v17 = vadd.f32 %v1109_v12, %v537_v6 }
 0x262   : > { %v1070_v18 = vpop.f32.mrf.mxu0  ;;  %v1111_v19 = vpop.f32.mrf.mxu1 }
 0x263   : > { %v1156_v20 = vpack.c.bf16 %v1155_v13, %v1155_v13  ;;  %1159 = vst [vmem:[%s367_s8] sm:$0xf] %v1158_v14  ;;  %v1162_v21 = vmul.f32 0.088388346, %v1069_v16  ;;  %v1166_v22 = vpack.c.bf16 %v1110_v17, %v1110_v17 }
 0x264   : > { %v1071_v23 = vpop.f32.mrf.mxu0  ;;  %v1112_v24 = vpop.f32.mrf.mxu1 }
 0x265   : > { %1157 = vst [vmem:[%s2307_s19] sm:$0xf] %v1156_v20  ;;  %v1163_v25 = vpack.c.bf16 %v1162_v21, %v1162_v21  ;;  %1526 = vst [vmem:[%s367_s8 + $0x4] sm:$0xf] %v1166_v22 }
 0x266   : > { %1915 = shalt.err (!%p1912_p7)
}
 0x267   : > { %s1916_s8 = scalar_lea.hbm %s2316_s20, 128  ;;  %s1920_s18 = scalar_lea.hbm %s2446_s6, 256 }
 0x268   : > { %p1917_p10 = scmp.ne.s32.totalorder %s2316_s20, %s1916_s8  ;;  %p1921_p1 = scmp.lt.s32.totalorder %s2316_s20, %s2446_s6 }
 0x269   : > { %p1922_p11 = scmp.lt.s32.totalorder %s1920_s18, %s1916_s8 }
 0x26a   : > { %p1918_p0 = pnand %p1917_p10, %p2204_p13 }
 0x26b   : > { %p1923_p2 = por %p1922_p11, %p1921_p1 }
 0x26c   : > { %p1919_p9 = pneg %p1918_p0 }
 0x26e   : > { %p1924_p3 = pnand %p1923_p2, %p1919_p9 }
 0x270   : > { %1927 = shalt.err (!%p1924_p3)
}
 0x271   : > { %s2055_s1 = smov 64   ;;  %s2056_s27 = smov 4   ;;  %1525 = vst [vmem:[%s2307_s19 + $0x4] sm:$0xf] %v1163_v25 }
 0x272   : > { %1558 = dma.vmem_to_hbm [thread:$0]  (%p2204_p13), %s2310_s9, 128, %s2316_s20, %s2327_s15, %s2055_s1, %s2055_s1, %s2056_s27  }
 0x273   : > { %s1173_s0 = scalar_lea.sflag [#allocation4], %s2234_s16  ;;  %s1928_s30 = scalar_lea.vmem %s2318_s23, 128 }
 0x274   : > { %p1929_p4 = scmp.ne.s32.totalorder %s2318_s23, %s1928_s30  ;;  %s2057_s8 = smov [#allocation10]  }
 0x275   : > { %s1932_s11 = sshll.u32 %s2057_s8, 4  ;;  %s1933_s11 = int_to_ptr.vmem [resolvable:$false] %s1932_s11 }
 0x276   : > { %p1930_p6 = pnand %p1929_p4, %p2204_p13  ;;  %s1934_s12 = scalar_lea.vmem %s1933_s11, 256 }
 0x277   : > { %p1935_p12 = scmp.lt.s32.totalorder %s2318_s23, %s1933_s11  ;;  %p1936_p5 = scmp.lt.s32.totalorder %s1934_s12, %s1928_s30 }
 0x278   : > { %p1931_p8 = pneg %p1930_p6 }
 0x279   : > { %p1937_p7 = por %p1936_p5, %p1935_p12 }
 0x27b   : > { %p1938_p10 = pnand %p1937_p7, %p1931_p8 }
 0x27d   : > { %1941 = shalt.err (!%p1938_p10)
}
 0x27e   : > { %s1942_s9 = scalar_lea.hbm %s2325_s14, 128  ;;  %s1946_s20 = scalar_lea.hbm %s2445_s5, 256 }
 0x27f   : > { %p1943_p0 = scmp.ne.s32.totalorder %s2325_s14, %s1942_s9  ;;  %p1947_p11 = scmp.lt.s32.totalorder %s2325_s14, %s2445_s5 }
 0x280   : > { %p1948_p2 = scmp.lt.s32.totalorder %s1946_s20, %s1942_s9 }
 0x281   : > { %p1944_p9 = pnand %p1943_p0, %p2204_p13 }
 0x282   : > { %p1949_p3 = por %p1948_p2, %p1947_p11 }
 0x283   : > { %p1945_p1 = pneg %p1944_p9 }
 0x285   : > { %p1950_p4 = pnand %p1949_p3, %p1945_p1 }
 0x287   : > { %1953 = shalt.err (!%p1950_p4)
}
 0x288   : > { %1557 = dma.vmem_to_hbm [thread:$0]  (%p2204_p13), %s2318_s23, 128, %s2325_s14, %s1173_s0, %s2055_s1, %s2055_s1, %s2056_s27   ;;  %v540_v26 = vsub.s32 4, %v2266_v15  ;;  %v544_v27 = vsub.s32 5, %v2266_v15 }
 0x289   : > { %s374_s30 = scalar_lea.vmem [#allocation13], %s2293_s3  ;;  %s2389_s0 = scalar_lea.hbm %s2447_s7, %s2304_s17 }
 0x28a   : > { %v541_v28 = vrot.slane %v2289_v1, %v540_v26  ;;  %v545_v29 = vrot.slane %v2289_v1, %v544_v27  ;;  %s1231_s8 = sshll.u32 %s374_s30, 4  ;;  %s2058_s11 = smov [#allocation13]   ;;  %s2383_s8 = int_to_ptr.vmem [resolvable:$true] %s1231_s8 }
 0x28b   : > { %s1954_s3 = scalar_lea.vmem %s2383_s8, 128  ;;  %s1958_s12 = sshll.u32 %s2058_s11, 4  ;;  %s1959_s12 = int_to_ptr.vmem [resolvable:$false] %s1958_s12 }
 0x28c   : > { %p1955_p6 = scmp.ne.s32.totalorder %s2383_s8, %s1954_s3  ;;  %s1960_s9 = scalar_lea.vmem %s1959_s12, 256 }
 0x28d   : > { %p1961_p5 = scmp.lt.s32.totalorder %s2383_s8, %s1959_s12  ;;  %p1962_p7 = scmp.lt.s32.totalorder %s1960_s9, %s1954_s3 }
 0x28e   : > { %p1956_p8 = pnand %p1955_p6, %p2204_p13 }
 0x28f   : > { %p1963_p10 = por %p1962_p7, %p1961_p5 }
 0x290   : > { %p1957_p12 = pneg %p1956_p8 }
 0x292   : > { %p1964_p0 = pnand %p1963_p10, %p1957_p12 }
 0x29e   : > { %v1148_v30 = vpop.f32.mrf.mxu0 }
 0x29f   : > { %v1149_v31 = vadd.f32 %v1148_v30, %v541_v28 }
 0x2a0   : > { %v1150_v32 = vpop.f32.mrf.mxu0 }
 0x2a1   : > { %v1160_v33 = vpack.c.bf16 %v1149_v31, %v1149_v31  ;;  %v1151_v34 = vadd.f32 %v1150_v32, %v545_v29 }
 0x2a2   : > { %v1152_v35 = vpop.f32.mrf.mxu0 }
 0x2a3   : > { %1161 = vst [vmem:[%s374_s30] sm:$0xf] %v1160_v33  ;;  %v1169_v15 = vpack.c.bf16 %v1151_v34, %v1151_v34 }
 0x2a4   : > { %v1153_v36 = vpop.f32.mrf.mxu0 }
 0x2a5   : > { %1527 = vst [vmem:[%s374_s30 + $0x4] sm:$0xf] %v1169_v15 }
 0x2a6   : > { %1967 = shalt.err (!%p1964_p0)
}
 0x2a7   : > { %s1968_s17 = scalar_lea.hbm %s2389_s0, 128  ;;  %s1972_s20 = scalar_lea.hbm %s2447_s7, 256 }
 0x2a8   : > { %p1969_p9 = scmp.ne.s32.totalorder %s2389_s0, %s1968_s17  ;;  %p1973_p2 = scmp.lt.s32.totalorder %s2389_s0, %s2447_s7 }
 0x2a9   : > { %p1974_p3 = scmp.lt.s32.totalorder %s1972_s20, %s1968_s17 }
 0x2aa   : > { %p1970_p1 = pnand %p1969_p9, %p2204_p13 }
 0x2ab   : > { %p1975_p4 = por %p1974_p3, %p1973_p2 }
 0x2ac   : > { %p1971_p11 = pneg %p1970_p1 }
 0x2ae   : > { %p1976_p6 = pnand %p1975_p4, %p1971_p11 }
 0x2b0   : > { %1979 = shalt.err (!%p1976_p6)
}
 0x2b1   : > { %1559 = dma.vmem_to_hbm [thread:$0]  (%p2204_p13), %s2383_s8, 128, %s2389_s0, %s2327_s15, %s2055_s1, %s2055_s1, %s2056_s27  }
 0x2b2 PF: > { %s1246_s30 = sand.u32 1, %s2026_s24   ;;  %p2473_p8 = scmp.ne.s32.totalorder %s2457_s10, 0 }
 0x2b3   : > { %p2474_p12 = scmp.ge.s32.totalorder %s2046_s29, 2  ;;  %s1247_s23 = scalar_lea.sflag [#allocation4], %s1246_s30 }
 0x2b5   : > { %p1578_p5 = pnand %p2474_p12, %p2473_p8 }
 0x2b7   : > { %p1579_p7 = pneg %p1578_p5 }
 0x2b9   : > { %2017 = dma.done.wait (%p1579_p7), %s1247_s23, 128  }
 0x2ba   : > { %2019 = vsyncadd (%p1579_p7), %s1247_s23, 4294967168  ;;  %s2475_s22 = sadd.s32 4294967294, %s2046_s29  }
 0x2bb   : > { %s1255_s14 = sand.u32 1, %s2475_s22  }
 0x2bc   : > { %s1256_s3 = scalar_lea.sflag [#allocation12], %s1255_s14 }
 0x2bd   : > { %2021 = dma.done.wait (%p1579_p7), %s1256_s3, 256  }
 0x2be   : > { %2023 = vsyncadd (%p1579_p7), %s1256_s3, 4294967040  ;;  %s29_s29 = sadd.s32 1, %s2046_s29   ;;  %s2476_s24 = smov %s2030_s25 }
 0x2bf   : > { %p26_p13 = scmp.ge.s32.totalorder %s29_s29, 4   ;;  %s2477_s25 = smov %s2034_s26 }
 0x2c0   : > { %s2478_s26 = smov %s2216_s13  ;;  %s2479_s27 = smov %s2042_s28 }
 0x2c1   : > { %s2480_s28 = smov %s2482_s21  ;;  %28 = sbr.rel (!%p26_p13) target bundleno = 15 (0xf), region = 132 }
 0x2c6   :  { %1270 = vsyncpa [#allocation3], 1 }
 0x2c7   :  { %1272 = vsyncpa [#allocation3 + $0x1], 1 }
 0x2c8   :  { %1273 = vsyncpa [#allocation6], 1 }
 0x2c9   :  { %1274 = vsyncpa [#allocation9], 1 }
 0x2ca   :  { %1275 = vsyncpa [#allocation4], 1 }
 0x2cb   :  { %1277 = vsyncpa [#allocation4 + $0x1], 1 }
 0x2cc   :  { %1278 = vsyncpa [#allocation12], 1 }
 0x2cd   :  { %1280 = vsyncpa [#allocation12 + $0x1], 1 }

</bundles_post_ra>
